<compile_context>
chip_gen: v7x
topology: tpu7x:2x2x1
jax: 0.10.0
libtpu: 0.0.40
codegen_flags: <defaults>
</compile_context>

<pallas_src>
import functools

import jax
import jax.numpy as jnp
from jax import lax
from jax.experimental import pallas as pl
from jax.experimental.pallas import tpu as pltpu  # noqa: F401  (TPU backend)

_LANE = 128


def _linear_leaky_kernel(x_ref, w_ref, b_ref, o_ref, *, negative_slope):
    # x: (M, K), w: (N_pad, K)  -> contract on K (no materialized transpose).
    v1 = lax.dot_general(
        x_ref[...],
        w_ref[...],
        dimension_numbers=(((1,), (1,)), ((), ())),
        preferred_element_type=jnp.float32,
    )
    v1 = v1 + b_ref[...]                       # (1, N_pad) broadcast add (VPU)
    # LeakyReLU: max(v, slope*v) == where(v > 0, v, slope*v) for 0 < slope < 1.
    o_ref[...] = jnp.maximum(v1, v1 * negative_slope).astype(o_ref.dtype)


@functools.partial(jax.jit, static_argnames=("negative_slope",))
def linear_leaky_relu(x, weight, bias, negative_slope):
    """x: (M, K) f32, weight: (N, K) f32 (PyTorch layout), bias: (N,) f32."""
    M, K = x.shape
    N, K2 = weight.shape
    assert K == K2, (K, K2)

    # One-time prep: pad the output-feature dim to a multiple of 128 so the
    # kernel's output is lane-dense (unmasked stores). Padded rows of the
    # weight / bias are zero, so the extra output columns are exactly zero
    # and are sliced away below.
    n_pad = max(_LANE, ((N + _LANE - 1) // _LANE) * _LANE)
    if n_pad != N:
        weight = jnp.pad(weight, ((0, n_pad - N), (0, 0)))
        bias = jnp.pad(bias, (0, n_pad - N))
    b2 = bias.reshape(1, n_pad)

    kernel = functools.partial(
        _linear_leaky_kernel, negative_slope=float(negative_slope)
    )

    out_padded = pl.pallas_call(
        kernel,
        out_shape=jax.ShapeDtypeStruct((M, n_pad), jnp.float32),
        in_specs=[
            pl.BlockSpec((M, K), lambda: (0, 0)),        # x
            pl.BlockSpec((n_pad, K), lambda: (0, 0)),    # weight (N, K) layout
            pl.BlockSpec((1, n_pad), lambda: (0, 0)),    # bias
        ],
        out_specs=pl.BlockSpec((M, n_pad), lambda: (0, 0)),
    )(x, weight, b2)

    return out_padded[:, :N]


if __name__ == "__main__":
    M, K, N = 20, 25, 16          # x1 is (20, 25) in the reference module
    negative_slope = 0.01

    key = jax.random.PRNGKey(0)
    kx, kw, kb = jax.random.split(key, 3)
    x1 = jax.random.normal(kx, (M, K), dtype=jnp.float32)
    weight = jax.random.normal(kw, (N, K), dtype=jnp.float32) * 0.1
    bias = jax.random.normal(kb, (N,), dtype=jnp.float32) * 0.1

    out = linear_leaky_relu(x1, weight, bias, negative_slope)
    out = jax.block_until_ready(out)

    # Reference in plain JAX (same semantics as the PyTorch module).
    v1 = x1 @ weight.T + bias
    ref = jnp.where(v1 > 0, v1, v1 * negative_slope)
    assert out.shape == (M, N), out.shape
    assert jnp.allclose(out, ref, atol=1e-5, rtol=1e-5)

    print("KERNEL_OK")
</pallas_src>

<mosaic_0001>
module attributes {stable_mosaic.version = 11 : i64} {
  func.func @_linear_leaky_kernel(%arg0: memref<20x25xf32, #tpu.memory_space<vmem>>, %arg1: memref<128x25xf32, #tpu.memory_space<vmem>>, %arg2: memref<1x128xf32, #tpu.memory_space<vmem>>, %arg3: memref<20x128xf32, #tpu.memory_space<vmem>>) attributes {dimension_semantics = [], scalar_prefetch = 0 : i64, scratch_operands = 0 : i64, tpu.core_type = #tpu.core_type<tc>} {
    %c0 = arith.constant 0 : index
    %c0_0 = arith.constant 0 : index
    %0 = vector.load %arg0[%c0, %c0_0] : memref<20x25xf32, #tpu.memory_space<vmem>>, vector<20x25xf32>
    %c0_1 = arith.constant 0 : index
    %c0_2 = arith.constant 0 : index
    %1 = vector.load %arg1[%c0_1, %c0_2] : memref<128x25xf32, #tpu.memory_space<vmem>>, vector<128x25xf32>
    %cst = arith.constant dense<0.000000e+00> : vector<20x128xf32>
    %2 = tpu.matmul %0, %1, %cst {dimension_numbers = #tpu.dot_dimension_numbers<[1], [1], [0], [0], [0, 0, 1, 0], [], []>} : vector<20x25xf32>, vector<128x25xf32>, vector<20x128xf32> -> vector<20x128xf32>
    %c0_3 = arith.constant 0 : index
    %c0_4 = arith.constant 0 : index
    %3 = vector.load %arg2[%c0_3, %c0_4] : memref<1x128xf32, #tpu.memory_space<vmem>>, vector<1x128xf32>
    %4 = vector.broadcast %3 : vector<1x128xf32> to vector<20x128xf32>
    %5 = arith.addf %2, %4 : vector<20x128xf32>
    %cst_5 = arith.constant 0.00999999977 : f32
    %6 = vector.broadcast %cst_5 : f32 to vector<20x128xf32>
    %7 = arith.mulf %5, %6 : vector<20x128xf32>
    %8 = arith.maximumf %5, %7 : vector<20x128xf32>
    %c0_6 = arith.constant 0 : index
    %c0_7 = arith.constant 0 : index
    %9 = vector.load %arg3[%c0_6, %c0_7] : memref<20x128xf32, #tpu.memory_space<vmem>>, vector<20x128xf32>
    tpu.vector_store %arg3[%c0_6, %c0_7], %8 {strides = array<i32>} : memref<20x128xf32, #tpu.memory_space<vmem>>, vector<20x128xf32>,
    return
  }
}

</mosaic_0001>

<bundles_post_ra>
// kernel: linear_leaky_relu.1
= control target key start
LH: loop header
LB: loop body
LE: loop exit
PB: predicated region body
PF: predicated region fallthrough
CT: control target
= control target key end

     0   :  { %vm40_vm0 = vcmask 203776   ;;  %v322_v0 = vmov 0.0|0.0   ;;  %vm323_vm2 = vmmov 0   ;;  %v324_v5 = vmov 0.0   ;;  %s458_s1 = inlined_call_operand.vmem [shape: f32[128,25], index: 1, kind: input, shape index: {}]   ;;  %s459_s0 = inlined_call_operand.vmem [shape: f32[20,25], index: 0, kind: input, shape index: {}]   ;;  %s460_s2 = inlined_call_operand.vmem [shape: f32[1,128], index: 2, kind: input, shape index: {}]   ;;  %s461_s3 = inlined_call_operand.vmem [shape: f32[20,128], index: 3, kind: output, shape index: {}]  }
   0x1   :  { %303 = vmatprep.subr.bf16.mxu1 %v322_v0  ;;  %v17_v1 = vld [vmem:[%s458_s1] sm:$0xff]  ;;  %v18_v2 = vld [vmem:[%s458_s1 + $0x8] sm:$0xff]  ;;  %vm353_vm1 = vmpackc.low %vm40_vm0, %vm40_vm0  ;;  %271 = vmatprep.subr.bf16.mxu0 %v322_v0 }
   0x2   :  { %v272_v4 = vpack.c.bf16 %v18_v2, %v17_v1  ;;  %265 = vmatprep.mubr.msk.f32.mxu1 %vm323_vm2, %v324_v5  ;;  %262 = vmatprep.mubr.msk.f32.mxu0 %vm323_vm2, %v324_v5  ;;  %v19_v6 = vld [vmem:[%s458_s1 + $0x10] sm:$0xff]  ;;  %v20_v7 = vld [vmem:[%s458_s1 + $0x18] sm:$0xff]  ;;  %v21_v9 = vld [vmem:[%s458_s1 + $0x20] sm:$0xff] }
   0x3   :  { %v276_v8 = vpack.c.bf16 %v20_v7, %v19_v6  ;;  %v22_v10 = vld [vmem:[%s458_s1 + $0x28] sm:$0xff]  ;;  %v23_v12 = vld [vmem:[%s458_s1 + $0x30] sm:$0xff]  ;;  %v24_v13 = vld [vmem:[%s458_s1 + $0x38] sm:$0xff] }
   0x4   :  { %311 = vmatpush3.bf16.xpose.msk.msra.mxu1 %vm353_vm1, %v272_v4  ;;  %274 = vmatpush3.bf16.xpose.msk.msra.mxu0 %vm353_vm1, %v272_v4  ;;  %v280_v11 = vpack.c.bf16 %v22_v10, %v21_v9  ;;  %v284_v14 = vpack.c.bf16 %v24_v13, %v23_v12  ;;  %v25_v15 = vld [vmem:[%s458_s1 + $0x40] sm:$0xff]  ;;  %v26_v16 = vld [vmem:[%s458_s1 + $0x48] sm:$0xff]  ;;  %v27_v18 = vld [vmem:[%s458_s1 + $0x50] sm:$0xff] }
   0x5   :  { %304 = vmatprep.subr.bf16.mxu1 %v322_v0  ;;  %275 = vmatprep.subr.bf16.mxu0 %v322_v0  ;;  %v288_v17 = vpack.c.bf16 %v26_v16, %v25_v15  ;;  %v28_v19 = vld [vmem:[%s458_s1 + $0x58] sm:$0xff]  ;;  %v29_v21 = vld [vmem:[%s458_s1 + $0x60] sm:$0xff]  ;;  %v30_v22 = vld [vmem:[%s458_s1 + $0x68] sm:$0xff] }
   0x6   :  { %v292_v20 = vpack.c.bf16 %v28_v19, %v27_v18  ;;  %v296_v23 = vpack.c.bf16 %v30_v22, %v29_v21  ;;  %v31_v24 = vld [vmem:[%s458_s1 + $0x70] sm:$0xff]  ;;  %v32_v25 = vld [vmem:[%s458_s1 + $0x78] sm:$0xff]  ;;  %v15_v27 = vld [vmem:[%s459_s0 + $0x8] sm:$0xff] }
   0x7   :  { %v300_v26 = vpack.c.bf16 %v32_v25, %v31_v24  ;;  %v14_v28 = vld [vmem:[%s459_s0] sm:$0xff]  ;;  %v16_v29 = vld [vmem:[%s459_s0 + $0x10] sm:$0xf] }
   0x8   :  { %v191_v30 = vld [vmem:[%s460_s2] ss:$0 sm:$0xff] }
   0xc   :  { %312 = vmatpush3.bf16.xpose.msk.msra.mxu1 %vm353_vm1, %v276_v8  ;;  %278 = vmatpush3.bf16.xpose.msk.msra.mxu0 %vm353_vm1, %v276_v8 }
   0xd   :  { %305 = vmatprep.subr.bf16.mxu1 %v322_v0  ;;  %279 = vmatprep.subr.bf16.mxu0 %v322_v0 }
  0x14   :  { %313 = vmatpush3.bf16.xpose.msk.msra.mxu1 %vm353_vm1, %v280_v11  ;;  %282 = vmatpush3.bf16.xpose.msk.msra.mxu0 %vm353_vm1, %v280_v11 }
  0x15   :  { %306 = vmatprep.subr.bf16.mxu1 %v322_v0  ;;  %283 = vmatprep.subr.bf16.mxu0 %v322_v0 }
  0x1c   :  { %314 = vmatpush3.bf16.xpose.msk.msra.mxu1 %vm353_vm1, %v284_v14  ;;  %286 = vmatpush3.bf16.xpose.msk.msra.mxu0 %vm353_vm1, %v284_v14 }
  0x1d   :  { %307 = vmatprep.subr.bf16.mxu1 %v322_v0  ;;  %287 = vmatprep.subr.bf16.mxu0 %v322_v0 }
  0x24   :  { %315 = vmatpush3.bf16.xpose.msk.msra.mxu1 %vm353_vm1, %v288_v17  ;;  %290 = vmatpush3.bf16.xpose.msk.msra.mxu0 %vm353_vm1, %v288_v17 }
  0x25   :  { %308 = vmatprep.subr.bf16.mxu1 %v322_v0  ;;  %291 = vmatprep.subr.bf16.mxu0 %v322_v0 }
  0x2c   :  { %316 = vmatpush3.bf16.xpose.msk.msra.mxu1 %vm353_vm1, %v292_v20  ;;  %294 = vmatpush3.bf16.xpose.msk.msra.mxu0 %vm353_vm1, %v292_v20 }
  0x2d   :  { %309 = vmatprep.subr.bf16.mxu1 %v322_v0  ;;  %295 = vmatprep.subr.bf16.mxu0 %v322_v0 }
  0x34   :  { %317 = vmatpush3.bf16.xpose.msk.msra.mxu1 %vm353_vm1, %v296_v23  ;;  %298 = vmatpush3.bf16.xpose.msk.msra.mxu0 %vm353_vm1, %v296_v23 }
  0x35   :  { %310 = vmatprep.subr.bf16.mxu1 %v322_v0  ;;  %299 = vmatprep.subr.bf16.mxu0 %v322_v0 }
  0x3c   :  { %318 = vmatpush3.bf16.xpose.msk.msra.mxu1 %vm353_vm1, %v300_v26  ;;  %302 = vmatpush3.bf16.xpose.msk.msra.mxu0 %vm353_vm1, %v300_v26 }
  0x43   :  { %266 = vmatmul.mubr.msk.f32.vlgmr.msra.gmra.mrb[0].mxu1 %vm40_vm0, %v15_v27  ;;  %263 = vmatmul.mubr.msk.f32.vlgmr.msra.gmra.mrb[0].mxu0 %vm40_vm0, %v14_v28 }
  0x44   :  { %268 = vmatprep.mubr.msk.f32.mxu1 %vm323_vm2, %v324_v5 }
  0x47   :  { %269 = vmatmul.mubr.msk.f32.gmra.mrb[2].mxu1 %vm40_vm0, %v16_v29 }
 0x116   :  { %v169_v31 = vpop.f32.mrb[0].mxu1  ;;  %v164_v32 = vpop.f32.mrb[0].mxu0 }
 0x117   :  { %v170_v33 = vadd.f32 %v191_v30, %v169_v31  ;;  %v267_v34 = vpop.f32.mrb[1].mxu1  ;;  %v165_v35 = vadd.f32 %v191_v30, %v164_v32  ;;  %v264_v36 = vpop.f32.mrb[1].mxu0 }
 0x119   :  { %v179_v37 = vmul.f32 0.01, %v170_v33  ;;  %v178_v38 = vmul.f32 0.01, %v165_v35 }
 0x11a   :  { %v174_v39 = vpop.f32.mrb[2].mxu1 }
 0x11b   :  { %v182_v40 = vmax.f32 %v170_v33, %v179_v37  ;;  %v181_v41 = vmax.f32 %v165_v35, %v178_v38  ;;  %v175_v42 = vadd.f32 %v191_v30, %v174_v39  ;;  %v270_v43 = vpop.f32.mrb[3].mxu1 }
 0x11d   :  { %185 = vst [vmem:[%s461_s3 + $0x8] sm:$0xff] %v182_v40  ;;  %184 = vst [vmem:[%s461_s3] sm:$0xff] %v181_v41  ;;  %v180_v44 = vmul.f32 0.01, %v175_v42 }
 0x11f   :  { %v183_v45 = vmax.f32 %v175_v42, %v180_v44 }
 0x121   :  { %186 = vst [vmem:[%s461_s3 + $0x10] sm:$0xf] %v183_v45 }

</bundles_post_ra>
